<compile_context>
chip_gen: v5e
topology: v5e:2x2
jax: 0.10.0
libtpu: 0.0.40
codegen_flags: <defaults>
</compile_context>

<pallas_src>
import jax
import jax.numpy as jnp
from jax.experimental import pallas as pl
from jax.experimental.pallas import tpu as pltpu


def _copy_kernel(x_ref, o_ref):
    # Identity copy of the current tile.
    o_ref[...] = x_ref[...]


def unflatten(x: jax.Array, unflatten_type: str = "3d") -> jax.Array:
    """Pallas implementation of UnFlatten.forward.

    Accepts x of shape (B, C) or (B, C, 1, ...) with only singleton trailing
    dims (same legality constraint as torch's .view here).
    """
    B = int(x.shape[0])
    C = int(x.shape[1])
    N = B * C
    target_shape = (B, C, 1, 1, 1) if unflatten_type == "3d" else (B, C, 1, 1)

    # ---- choose a lane-dense 2-D slab layout for the copy -------------------
    LANES = 128
    if N % LANES == 0:
        rows, cols = N // LANES, LANES
    else:
        # Small / irregular element count: full-array block (block_shape equals
        # the array shape, so the (8,128) divisibility constraint does not apply).
        rows, cols = B, C
    x2d = jnp.reshape(x, (rows, cols))  # raises if trailing dims are non-singleton

    # ---- tile rows so per-block footprint stays ~2 MiB ----------------------
    dtype_bytes = jnp.dtype(x2d.dtype).itemsize
    target_block_bytes = 2 * 1024 * 1024
    max_rows = max(1, target_block_bytes // max(1, cols * dtype_bytes))
    if cols == LANES and rows % 8 == 0 and max_rows >= 8:
        tb = min(rows, (max_rows // 8) * 8)
        # tb must evenly divide rows and stay a multiple of 8 (f32 sublane tile).
        while rows % tb != 0:
            tb -= 8
        tb = max(tb, 8)
    else:
        tb = rows  # single full-array block

    grid = (rows // tb,)

    copied = pl.pallas_call(
        _copy_kernel,
        out_shape=jax.ShapeDtypeStruct((rows, cols), x2d.dtype),
        grid=grid,
        in_specs=[pl.BlockSpec((tb, cols), lambda i: (i, 0))],
        out_specs=pl.BlockSpec((tb, cols), lambda i: (i, 0)),
        input_output_aliases={0: 0},  # in-place / donatable copy
        compiler_params=pltpu.CompilerParams(
            dimension_semantics=("parallel",),  # shards across TCs on v7x
        ),
    )(x2d)

    # Free metadata-only reshape to attach the trailing singleton dims.
    return jnp.reshape(copied, target_shape)


if __name__ == "__main__":
    key = jax.random.PRNGKey(0)

    # --- small, non-lane-aligned case (B=2, C=32) ---------------------------
    B, C = 2, 32
    x = jax.random.normal(key, (B, C), dtype=jnp.float32)

    y3d = jax.block_until_ready(unflatten(x, unflatten_type="3d"))
    assert y3d.shape == (B, C, 1, 1, 1), y3d.shape
    assert jnp.allclose(y3d.reshape(B, C), x), "3d copy mismatch"

    y2d = jax.block_until_ready(unflatten(x, unflatten_type="2d"))
    assert y2d.shape == (B, C, 1, 1), y2d.shape
    assert jnp.allclose(y2d.reshape(B, C), x), "2d copy mismatch"

    # --- lane-dense case (B*C divisible by 128) ------------------------------
    B2, C2 = 8, 256
    x2 = jax.random.normal(jax.random.PRNGKey(1), (B2, C2), dtype=jnp.float32)
    y3d2 = jax.block_until_ready(unflatten(x2, unflatten_type="3d"))
    assert y3d2.shape == (B2, C2, 1, 1, 1), y3d2.shape
    assert jnp.allclose(y3d2.reshape(B2, C2), x2), "lane-dense 3d copy mismatch"

    # --- input already carrying singleton dims (mirrors torch .view use) ----
    x3 = x.reshape(B, C, 1, 1)
    y3 = jax.block_until_ready(unflatten(x3, unflatten_type="3d"))
    assert y3.shape == (B, C, 1, 1, 1), y3.shape
    assert jnp.allclose(y3.reshape(B, C), x), "re-view copy mismatch"

    print("KERNEL_OK")
</pallas_src>

<mosaic_0001>
module attributes {stable_mosaic.version = 11 : i64} {
  func.func @_copy_kernel(%arg0: i32, %arg1: memref<2x32xf32, #tpu.memory_space<vmem>>, %arg2: memref<2x32xf32, #tpu.memory_space<vmem>>) attributes {dimension_semantics = [#tpu.dimension_semantics<parallel>], iteration_bounds = array<i64: 1>, scalar_prefetch = 0 : i64, scratch_operands = 0 : i64, tpu.core_type = #tpu.core_type<tc>, window_params = [{transform_indices = @transform_0, window_bounds = array<i64: 2, 32>}, {transform_indices = @transform_1, window_bounds = array<i64: 2, 32>}]} {
    %c0 = arith.constant 0 : index
    %c0_0 = arith.constant 0 : index
    %0 = vector.load %arg1[%c0, %c0_0] : memref<2x32xf32, #tpu.memory_space<vmem>>, vector<2x32xf32>
    %c0_1 = arith.constant 0 : index
    %c0_2 = arith.constant 0 : index
    %1 = vector.load %arg2[%c0_1, %c0_2] : memref<2x32xf32, #tpu.memory_space<vmem>>, vector<2x32xf32>
    tpu.vector_store %arg2[%c0_1, %c0_2], %0 {strides = array<i32>} : memref<2x32xf32, #tpu.memory_space<vmem>>, vector<2x32xf32>,
    return
  }
  func.func @transform_0(%arg0: i32) -> (i32, i32) {
    %c0_i32 = arith.constant 0 : i32
    %c0_i32_0 = arith.constant 0 : i32
    return %arg0, %c0_i32 : i32, i32
  }
  func.func @transform_1(%arg0: i32) -> (i32, i32) {
    %c0_i32 = arith.constant 0 : i32
    %c0_i32_0 = arith.constant 0 : i32
    return %arg0, %c0_i32 : i32, i32
  }
}

</mosaic_0001>

<bundles_post_ra>
// kernel: tpu_custom_call.1
= control target key start
LH: loop header
LB: loop body
LE: loop exit
PB: predicated region body
PF: predicated region fallthrough
CT: control target
= control target key end

     0   :  { %6 = vsyncpa [#allocation3], 0  ;;  %s115_s0 = inlined_call_operand.hbm [shape: f32[2,32], index: 0, kind: input, shape index: {}, may-alias: {0,1}]   ;;  %s116_s1 = inlined_call_operand.hbm [shape: f32[2,32], index: 1, kind: output, shape index: {}, may-alias: {0,1}]  }
   0x1   :  { %7 = vsyncpa [#allocation4], 0  ;;  %s13_s8 = sshll.u32 %s115_s0, 4  ;;  %s97_s9 = smov [#allocation2]   ;;  %s14_s8 = int_to_ptr.hbm [resolvable:$true] %s13_s8 }
   0x2   :  { %s15_s10 = sshll.u32 %s97_s9, 4  ;;  %s16_s10 = int_to_ptr.vmem [resolvable:$true] %s15_s10 }
   0x3   :  { %18 = dma.hbm_to_vmem [thread:$0]  %s14_s8, 32, %s16_s10, [#allocation3]  }
   0x4   :  { %93 = dma.done.wait [#allocation3], 32  }
   0x5   :  { %94 = vsyncadd [#allocation3], 4294967264  ;;  %s98_s11 = smov [#allocation5]   ;;  %s33_s15 = sshll.u32 %s116_s1, 4  ;;  %vm24_vm0 = vcmask 254976   ;;  %s34_s15 = int_to_ptr.hbm [resolvable:$true] %s33_s15 }
   0x6   :  { %s31_s12 = sshll.u32 %s98_s11, 4  ;;  %v23_v0 = vld [vmem:[#allocation2] sm:$0x3]  ;;  %s32_s12 = int_to_ptr.vmem [resolvable:$true] %s31_s12 }
   0x7   :  { %25 = vst.msk [vmem:[#allocation5] sm:$0x3] %vm24_vm0, %v23_v0 }
   0x8   :  { %36 = dma.vmem_to_hbm [thread:$0]  %s32_s12, 32, %s34_s15, [#allocation4]  }
   0x9   :  { %95 = dma.done.wait [#allocation4], 32  }
   0xa   :  { %96 = vsyncadd [#allocation4], 4294967264 }
   0xb   :  { %41 = vsyncpa [#allocation3], 1 }
   0xc   :  { %42 = vsyncpa [#allocation4], 1 }

</bundles_post_ra>
